<compile_context>
chip_gen: v7x
topology: tpu7x:2x2x1
jax: 0.10.0
libtpu: 0.0.40
codegen_flags: <defaults>
</compile_context>

<pallas_src>
import functools

import jax
import jax.numpy as jnp
from jax.experimental import pallas as pl
from jax.experimental.pallas import tpu as pltpu

LANES = 128
TARGET_BLOCK_BYTES = 4 * 1024 * 1024     # ~4 MiB per input block
VMEM_LIMIT_BYTES = 32 * 1024 * 1024      # 2 inputs x 2 buffers x 4 MiB + headroom


def _device_kind() -> str:
    try:
        return jax.devices()[0].device_kind.lower()
    except Exception:
        return ""


_KIND = _device_kind()
_IS_V7X = "v7" in _KIND
# v6e/v7x VALUs handle bf16 natively; v5e (and older) do not.
_HAS_BF16_VPU = ("v6" in _KIND) or _IS_V7X
# Leading "parallel" grid axis: 2 feeds both v7x TensorCores, 1 on single-TC chips.
NUM_SPLITS = 2 if _IS_V7X else 1


def _mae_sum_kernel(p_ref, t_ref, o_ref, *, tile_rows, rows_valid,
                    tiles_per_split, native_abs):
    """Accumulate sum(|p - t|) over row tiles into a resident (1, 8, 128) f32 block."""
    c = pl.program_id(0)   # split index ("parallel")
    i = pl.program_id(1)   # row-tile index within split ("arbitrary")

    @pl.when(i == 0)
    def _():
        o_ref[...] = jnp.zeros_like(o_ref)

    # Global row offset of this tile.  Only the tile that straddles the end of
    # the valid rows (or a redundant clamped tile of split 1) pays for masking.
    row_start = (c * tiles_per_split + i) * tile_rows
    is_full = row_start + tile_rows <= rows_valid

    def _fold(diff_f32):
        # Fold the tile to an (8, 128) vreg-shaped partial sum on the VPU; the
        # expensive cross-lane reduction happens exactly once, in the wrapper.
        return diff_f32.reshape(tile_rows // 8, 8, LANES).sum(axis=0)[None, :, :]

    @pl.when(is_full)
    def _():
        if native_abs:
            # bf16/f16 on v6e/v7x (or already-f32): abs/sub in native dtype,
            # upcast only at the accumulation tree.
            diff = jnp.abs(p_ref[...] - t_ref[...]).astype(jnp.float32)
        else:
            diff = jnp.abs(p_ref[...].astype(jnp.float32)
                           - t_ref[...].astype(jnp.float32))
        o_ref[...] += _fold(diff)

    @pl.when(jnp.logical_not(is_full))
    def _():
        # NOTE: the DMA of a straddling/clamped block reads rows past the valid
        # range; correctness depends entirely on this mask — never remove it.
        row_ids = row_start + jax.lax.broadcasted_iota(
            jnp.int32, (tile_rows, LANES), 0)
        p = p_ref[...].astype(jnp.float32)
        t = t_ref[...].astype(jnp.float32)
        diff = jnp.where(row_ids < rows_valid, jnp.abs(p - t), 0.0)
        o_ref[...] += _fold(diff)


@jax.jit
def mae_criterion(pred, target):
    """mean(|pred - target|) — matches torch.mean(torch.abs(pred - target))."""
    assert pred.shape == target.shape
    if pred.dtype != target.dtype:
        cdt = jnp.promote_types(pred.dtype, target.dtype)
        pred = pred.astype(cdt)
        target = target.astype(cdt)

    n = pred.size
    p_flat = pred.reshape(-1)
    t_flat = target.reshape(-1)

    itemsize = p_flat.dtype.itemsize
    pack = max(8, 32 // max(itemsize, 1))     # sublane packing: f32->8, bf16->16, i8->32

    rows_full = n // LANES
    rem = n - rows_full * LANES               # < 128 trailing elements -> plain jnp

    if rows_full < pack:
        # Tiny input: not worth a kernel launch.
        return jnp.mean(jnp.abs(p_flat.astype(jnp.float32)
                                - t_flat.astype(jnp.float32)))

    # Dtype-aware tile: ~TARGET_BLOCK_BYTES per input block, multiple of the
    # dtype's sublane packing, never larger than the (packed) row count.
    max_rows = max(pack, (TARGET_BLOCK_BYTES // (LANES * itemsize)) // pack * pack)
    tile_rows = min(max_rows, rows_full // pack * pack)
    n_row_blocks = pl.cdiv(rows_full, tile_rows)
    tiles_per_split = pl.cdiv(n_row_blocks, NUM_SPLITS)

    n_main = rows_full * LANES
    if rem == 0:
        p_main, t_main = p_flat, t_flat       # no copy in the common case
    else:
        p_main, t_main = p_flat[:n_main], t_flat[:n_main]   # rare: n % 128 != 0
    p2 = p_main.reshape(rows_full, LANES)
    t2 = t_main.reshape(rows_full, LANES)

    native_abs = (p2.dtype == jnp.float32) or (
        p2.dtype in (jnp.dtype(jnp.bfloat16), jnp.dtype(jnp.float16))
        and _HAS_BF16_VPU)

    if NUM_SPLITS == 1:
        def in_map(c, i):                     # no clamp needed: all blocks valid
            return (i, 0)
    else:
        def in_map(c, i):
            # Clamp so the DMA block index is always valid; redundant tiles of
            # the second split are zeroed in-kernel via the row-id mask.
            return (jnp.minimum(c * tiles_per_split + i, n_row_blocks - 1), 0)

    kernel = functools.partial(
        _mae_sum_kernel,
        tile_rows=tile_rows,
        rows_valid=rows_full,
        tiles_per_split=tiles_per_split,
        native_abs=native_abs,
    )

    cost = pl.CostEstimate(
        flops=3 * n_main,                                            # sub + abs + add
        bytes_accessed=2 * n_main * itemsize + NUM_SPLITS * 8 * LANES * 4,
        transcendentals=0,
    )

    partials = pl.pallas_call(
        kernel,
        out_shape=jax.ShapeDtypeStruct((NUM_SPLITS, 8, LANES), jnp.float32),
        grid_spec=pltpu.PrefetchScalarGridSpec(
            num_scalar_prefetch=0,
            grid=(NUM_SPLITS, tiles_per_split),
            in_specs=[
                pl.BlockSpec((tile_rows, LANES), in_map),
                pl.BlockSpec((tile_rows, LANES), in_map),
            ],
            out_specs=pl.BlockSpec((1, 8, LANES), lambda c, i: (c, 0, 0)),
        ),
        compiler_params=pltpu.CompilerParams(
            dimension_semantics=("parallel", "arbitrary"),
            vmem_limit_bytes=VMEM_LIMIT_BYTES,
        ),
        cost_estimate=cost,
    )(p2, t2)

    total = jnp.sum(partials)
    if rem:
        tail = jnp.abs(p_flat[n_main:].astype(jnp.float32)
                       - t_flat[n_main:].astype(jnp.float32))
        total = total + jnp.sum(tail)
    return total / jnp.float32(n)


if __name__ == "__main__":
    key = jax.random.PRNGKey(0)
    k1, k2 = jax.random.split(key)

    # Small shapes consistent with the module's forward (any matching shapes).
    pred = jax.random.normal(k1, (2, 4, 16, 16), dtype=jnp.float32)
    target = jax.random.normal(k2, (2, 4, 16, 16), dtype=jnp.float32)

    loss = mae_criterion(pred, target)
    jax.block_until_ready(loss)

    # Reference check in plain JAX (same semantics as torch.mean(torch.abs(.)))
    ref = jnp.mean(jnp.abs(pred - target))
    assert jnp.allclose(loss, ref, rtol=1e-5, atol=1e-5), (loss, ref)

    print("KERNEL_OK")
</pallas_src>

<mosaic_0001>
module attributes {stable_mosaic.version = 11 : i64} {
  func.func @_mae_sum_kernel(%arg0: i32, %arg1: i32, %arg2: memref<16x128xf32, #tpu.memory_space<vmem>>, %arg3: memref<16x128xf32, #tpu.memory_space<vmem>>, %arg4: memref<1x8x128xf32, #tpu.memory_space<vmem>>) attributes {dimension_semantics = [#tpu.dimension_semantics<parallel>, #tpu.dimension_semantics<arbitrary>], iteration_bounds = array<i64: 1, 1>, scalar_prefetch = 0 : i64, scratch_operands = 0 : i64, tpu.core_type = #tpu.core_type<tc>, window_params = [{transform_indices = @transform_0, window_bounds = array<i64: 16, 128>}, {transform_indices = @transform_1, window_bounds = array<i64: 16, 128>}, {transform_indices = @transform_2, window_bounds = array<i64: 1, 8, 128>}]} {
    %c0_i32 = arith.constant 0 : i32
    %0 = arith.cmpi eq, %arg1, %c0_i32 : i32
    %1 = arith.extui %0 : i1 to i32
    %c0_i32_0 = arith.constant 0 : i32
    %2 = arith.cmpi ne, %1, %c0_i32_0 : i32
    scf.if %2 {
      %cst = arith.constant 0.000000e+00 : f32
      %13 = vector.broadcast %cst : f32 to vector<1x8x128xf32>
      %c0 = arith.constant 0 : index
      %c0_5 = arith.constant 0 : index
      %c0_6 = arith.constant 0 : index
      %14 = vector.load %arg4[%c0, %c0_5, %c0_6] : memref<1x8x128xf32, #tpu.memory_space<vmem>>, vector<1x8x128xf32>
      tpu.vector_store %arg4[%c0, %c0_5, %c0_6], %13 {strides = array<i32>} : memref<1x8x128xf32, #tpu.memory_space<vmem>>, vector<1x8x128xf32>,
    } else {
    }
    %c1_i32 = arith.constant 1 : i32
    %3 = arith.muli %arg0, %c1_i32 : i32
    %4 = arith.addi %3, %arg1 : i32
    %c16_i32 = arith.constant 16 : i32
    %5 = arith.muli %4, %c16_i32 : i32
    %c16_i32_1 = arith.constant 16 : i32
    %6 = arith.addi %5, %c16_i32_1 : i32
    %c16_i32_2 = arith.constant 16 : i32
    %7 = arith.cmpi sle, %6, %c16_i32_2 : i32
    %8 = arith.extui %7 : i1 to i32
    %c0_i32_3 = arith.constant 0 : i32
    %9 = arith.cmpi ne, %8, %c0_i32_3 : i32
    scf.if %9 {
      %c0 = arith.constant 0 : index
      %c0_5 = arith.constant 0 : index
      %13 = vector.load %arg2[%c0, %c0_5] : memref<16x128xf32, #tpu.memory_space<vmem>>, vector<16x128xf32>
      %c0_6 = arith.constant 0 : index
      %c0_7 = arith.constant 0 : index
      %14 = vector.load %arg3[%c0_6, %c0_7] : memref<16x128xf32, #tpu.memory_space<vmem>>, vector<16x128xf32>
      %15 = arith.subf %13, %14 : vector<16x128xf32>
      %16 = math.absf %15 : vector<16x128xf32>
      %c0_8 = arith.constant 0 : index
      %c0_9 = arith.constant 0 : index
      %c0_10 = arith.constant 0 : index
      %17 = vector.load %arg4[%c0_8, %c0_9, %c0_10] : memref<1x8x128xf32, #tpu.memory_space<vmem>>, vector<1x8x128xf32>
      %18 = vector.shape_cast %16 : vector<16x128xf32> to vector<2x8x128xf32>
      %cst = arith.constant dense<0.000000e+00> : vector<8x128xf32>
      %19 = vector.multi_reduction <add>, %18, %cst [0] : vector<2x8x128xf32> to vector<8x128xf32>
      %20 = vector.shape_cast %19 : vector<8x128xf32> to vector<1x8x128xf32>
      %21 = arith.addf %17, %20 : vector<1x8x128xf32>
      %c0_11 = arith.constant 0 : index
      %c0_12 = arith.constant 0 : index
      %c0_13 = arith.constant 0 : index
      %22 = vector.load %arg4[%c0_11, %c0_12, %c0_13] : memref<1x8x128xf32, #tpu.memory_space<vmem>>, vector<1x8x128xf32>
      tpu.vector_store %arg4[%c0_11, %c0_12, %c0_13], %21 {strides = array<i32>} : memref<1x8x128xf32, #tpu.memory_space<vmem>>, vector<1x8x128xf32>,
    } else {
    }
    %true = arith.constant true
    %10 = arith.xori %7, %true : i1
    %11 = arith.extui %10 : i1 to i32
    %c0_i32_4 = arith.constant 0 : i32
    %12 = arith.cmpi ne, %11, %c0_i32_4 : i32
    scf.if %12 {
      %13 = tpu.iota {dimensions = array<i32: 0>} : vector<16x128xi32>
      %14 = vector.broadcast %5 : i32 to vector<16x128xi32>
      %15 = arith.addi %14, %13 : vector<16x128xi32>
      %c0 = arith.constant 0 : index
      %c0_5 = arith.constant 0 : index
      %16 = vector.load %arg2[%c0, %c0_5] : memref<16x128xf32, #tpu.memory_space<vmem>>, vector<16x128xf32>
      %c0_6 = arith.constant 0 : index
      %c0_7 = arith.constant 0 : index
      %17 = vector.load %arg3[%c0_6, %c0_7] : memref<16x128xf32, #tpu.memory_space<vmem>>, vector<16x128xf32>
      %c16_i32_8 = arith.constant 16 : i32
      %18 = vector.broadcast %c16_i32_8 : i32 to vector<16x128xi32>
      %19 = arith.cmpi slt, %15, %18 : vector<16x128xi32>
      %20 = arith.subf %16, %17 : vector<16x128xf32>
      %21 = math.absf %20 : vector<16x128xf32>
      %cst = arith.constant 0.000000e+00 : f32
      %22 = vector.broadcast %cst : f32 to vector<16x128xf32>
      %23 = arith.select %19, %21, %22 : vector<16x128xi1>, vector<16x128xf32>
      %c0_9 = arith.constant 0 : index
      %c0_10 = arith.constant 0 : index
      %c0_11 = arith.constant 0 : index
      %24 = vector.load %arg4[%c0_9, %c0_10, %c0_11] : memref<1x8x128xf32, #tpu.memory_space<vmem>>, vector<1x8x128xf32>
      %25 = vector.shape_cast %23 : vector<16x128xf32> to vector<2x8x128xf32>
      %cst_12 = arith.constant dense<0.000000e+00> : vector<8x128xf32>
      %26 = vector.multi_reduction <add>, %25, %cst_12 [0] : vector<2x8x128xf32> to vector<8x128xf32>
      %27 = vector.shape_cast %26 : vector<8x128xf32> to vector<1x8x128xf32>
      %28 = arith.addf %24, %27 : vector<1x8x128xf32>
      %c0_13 = arith.constant 0 : index
      %c0_14 = arith.constant 0 : index
      %c0_15 = arith.constant 0 : index
      %29 = vector.load %arg4[%c0_13, %c0_14, %c0_15] : memref<1x8x128xf32, #tpu.memory_space<vmem>>, vector<1x8x128xf32>
      tpu.vector_store %arg4[%c0_13, %c0_14, %c0_15], %28 {strides = array<i32>} : memref<1x8x128xf32, #tpu.memory_space<vmem>>, vector<1x8x128xf32>,
    } else {
    }
    return
  }
  func.func @transform_0(%arg0: i32, %arg1: i32) -> (i32, i32) {
    %c0_i32 = arith.constant 0 : i32
    %c0_i32_0 = arith.constant 0 : i32
    return %arg1, %c0_i32 : i32, i32
  }
  func.func @transform_1(%arg0: i32, %arg1: i32) -> (i32, i32) {
    %c0_i32 = arith.constant 0 : i32
    %c0_i32_0 = arith.constant 0 : i32
    return %arg1, %c0_i32 : i32, i32
  }
  func.func @transform_2(%arg0: i32, %arg1: i32) -> (i32, i32, i32) {
    %c0_i32 = arith.constant 0 : i32
    %c0_i32_0 = arith.constant 0 : i32
    %c0_i32_1 = arith.constant 0 : i32
    return %arg0, %c0_i32, %c0_i32_0 : i32, i32, i32
  }
}

</mosaic_0001>

<bundles_post_ra>
// kernel: mae_criterion.1
= control target key start
LH: loop header
LB: loop body
LE: loop exit
PB: predicated region body
PF: predicated region fallthrough
CT: control target
= control target key end

     0   :  { %s96_s0 = inlined_call_operand.vmem [shape: f32[16,128], index: 0, kind: input, shape index: {}]   ;;  %s97_s1 = inlined_call_operand.vmem [shape: f32[16,128], index: 1, kind: input, shape index: {}]   ;;  %s98_s2 = inlined_call_operand.vmem [shape: f32[1,8,128], index: 2, kind: output, shape index: {}]  }
   0x1   :  { %v23_v0 = vld [vmem:[%s96_s0] sm:$0xff]  ;;  %v24_v1 = vld [vmem:[%s96_s0 + $0x8] sm:$0xff] }
   0x2   :  { %v25_v2 = vld [vmem:[%s97_s1] sm:$0xff]  ;;  %v26_v3 = vld [vmem:[%s97_s1 + $0x8] sm:$0xff] }
   0x3   :  { %v27_v4 = vsub.f32 %v23_v0, %v25_v2  ;;  %v28_v5 = vsub.f32 %v24_v1, %v26_v3 }
   0x5   :  { %v29_v6 = vand.u32 2147483647, %v27_v4  ;;  %v30_v7 = vand.u32 2147483647, %v28_v5 }
   0x7   :  { %v32_v8 = vadd.f32 %v30_v7, %v29_v6 }
   0x9   :  { %34 = vst [vmem:[%s98_s2] sm:$0xff] %v32_v8 }

</bundles_post_ra>
